<compile_context>
chip_gen: v6e
topology: v6e:2x2x1
jax: 0.10.0
libtpu: 0.0.40
codegen_flags: <defaults>
</compile_context>

<pallas_src>
import functools
import math

import jax
import jax.numpy as jnp
from jax.experimental import pallas as pl
from jax.experimental.pallas import tpu as pltpu


# ----------------------------------------------------------------------------
# Helpers
# ----------------------------------------------------------------------------
def _round_up(x, m):
    return (x + m - 1) // m * m


def _choose_tk(kp):
    """Largest K-tile (multiple of 128) in ~[128, 1024] that divides Kp."""
    if kp <= 1024:
        return kp
    for cand in (1024, 768, 512, 384, 256, 128):
        if kp % cand == 0:
            return cand
    return 128


def _choose_tm(m):
    """Big M tiles amortize per-grid-step overhead; keep multiples of 8."""
    if m >= 512:
        return 512
    if m >= 256:
        return 256
    return _round_up(max(m, 1), 8)


def _maybe_pad2d(a, rows, cols):
    if a.shape[0] == rows and a.shape[1] == cols:
        return a
    return jnp.pad(a, ((0, rows - a.shape[0]), (0, cols - a.shape[1])))


# ----------------------------------------------------------------------------
# Pallas kernel: K-tiled bf16 matmul with f32 accumulator and fused epilogue
#   out = act( sum_k A_k @ W_k  + bias [+ residual] )
# ----------------------------------------------------------------------------
@functools.lru_cache(maxsize=None)
def _make_matmul_kernel(act, has_res):
    def kernel(*refs):
        if has_res:
            a_ref, w_ref, b_ref, r_ref, o_ref, acc_ref = refs
        else:
            a_ref, w_ref, b_ref, o_ref, acc_ref = refs
            r_ref = None

        @pl.when(pl.program_id(2) == 0)
        def _init():
            acc_ref[...] = jnp.zeros_like(acc_ref)

        acc_ref[...] += jnp.dot(a_ref[...], w_ref[...],
                                preferred_element_type=jnp.float32)

        @pl.when(pl.program_id(2) == pl.num_programs(2) - 1)
        def _epilogue():
            y = acc_ref[...] + b_ref[...]
            if has_res:
                y = y + r_ref[...].astype(jnp.float32)
            if act == "relu":
                y = jnp.maximum(y, 0.0)
            o_ref[...] = y.astype(o_ref.dtype)

    return kernel


def fused_conv_matmul(patches, wmat, bias, *, act, tk, tn, residual=None):
    """patches: (M, K) bf16; wmat: (Kp, Np) bf16 (pre-padded); bias: (1, Np) f32.

    Returns (M, Np) bf16 = act(patches @ wmat + bias [+ residual]).
    """
    M, K = patches.shape
    Kp, Np = wmat.shape
    tm = _choose_tm(M)
    Mp = _round_up(M, tm)

    a = _maybe_pad2d(patches, Mp, Kp).astype(jnp.bfloat16)

    nk = Kp // tk
    grid = (Mp // tm, Np // tn, nk)

    w_spec_kw = {}
    if nk >= 3:
        # Deeper pipelining on the weight stream hides HBM latency for big-K layers.
        w_spec_kw["pipeline_mode"] = pl.Buffered(3)

    in_specs = [
        pl.BlockSpec((tm, tk), lambda i, j, k: (i, k)),
        pl.BlockSpec((tk, tn), lambda i, j, k: (k, j), **w_spec_kw),
        pl.BlockSpec((1, tn), lambda i, j, k: (0, j)),
    ]
    inputs = [a, wmat, bias]

    has_res = residual is not None
    if has_res:
        r = _maybe_pad2d(residual, Mp, Np).astype(jnp.bfloat16)
        in_specs.append(pl.BlockSpec((tm, tn), lambda i, j, k: (i, j)))
        inputs.append(r)

    bytes_accessed = (Mp * Kp + Kp * Np + Mp * Np) * 2 + Np * 4
    if has_res:
        bytes_accessed += Mp * Np * 2

    out = pl.pallas_call(
        _make_matmul_kernel(act, has_res),
        out_shape=jax.ShapeDtypeStruct((Mp, Np), jnp.bfloat16),
        grid_spec=pltpu.PrefetchScalarGridSpec(
            num_scalar_prefetch=0,
            grid=grid,
            in_specs=in_specs,
            out_specs=pl.BlockSpec((tm, tn), lambda i, j, k: (i, j)),
            scratch_shapes=[pltpu.VMEM((tm, tn), jnp.float32)],
        ),
        compiler_params=pltpu.CompilerParams(
            dimension_semantics=("parallel", "parallel", "arbitrary")),
        cost_estimate=pl.CostEstimate(flops=2 * Mp * Kp * Np,
                                      transcendentals=0,
                                      bytes_accessed=bytes_accessed),
    )(*inputs)
    return out[:M, :]


# ----------------------------------------------------------------------------
# Plain-JAX glue: im2col, maxpool, bilinear upsample
# ----------------------------------------------------------------------------
def _im2col(x, kh, kw, stride, pad):
    N, H, W, C = x.shape
    xp = jnp.pad(x, ((0, 0), (pad, pad), (pad, pad), (0, 0)))
    OH = (H + 2 * pad - kh) // stride + 1
    OW = (W + 2 * pad - kw) // stride + 1
    cols = []
    for dy in range(kh):
        for dx in range(kw):
            cols.append(xp[:, dy:dy + stride * OH:stride,
                           dx:dx + stride * OW:stride, :])
    patches = jnp.concatenate(cols, axis=-1)          # (N, OH, OW, kh*kw*C)
    return patches.reshape(N * OH * OW, kh * kw * C), OH, OW


def apply_conv(x, wts, cfg, residual=None):
    """Conv (+folded BN) + bias (+fused residual) + activation, NHWC bf16."""
    N = x.shape[0]
    k, s, p = cfg["k"], cfg["stride"], cfg["pad"]
    if k == 1 and p == 0:
        xs = x[:, ::s, ::s, :] if s > 1 else x
        OH, OW = xs.shape[1], xs.shape[2]
        patches = xs.reshape(N * OH * OW, xs.shape[3])
    else:
        # TODO(synk): fold the kh*kw taps into the in-kernel K loop (implicit im2col
        # via shifted input windows) to avoid materializing the patch matrix in HBM.
        patches, OH, OW = _im2col(x, k, k, s, p)

    res2d = None
    if residual is not None:
        res2d = residual.reshape(N * OH * OW, residual.shape[-1])

    out = fused_conv_matmul(patches, wts["w"], wts["b"], act=cfg["act"],
                            tk=cfg["tk"], tn=cfg["tn"], residual=res2d)
    return out[:, :cfg["cout"]].reshape(N, OH, OW, cfg["cout"])


def maxpool_3x3_s2_p1(x):
    return jax.lax.reduce_window(
        x, jnp.array(-jnp.inf, dtype=x.dtype), jax.lax.max,
        window_dimensions=(1, 3, 3, 1), window_strides=(1, 2, 2, 1),
        padding=((0, 0), (1, 1), (1, 1), (0, 0)))


def upsample2x_bilinear(x):
    N, H, W, C = x.shape
    y = jax.image.resize(x.astype(jnp.float32), (N, 2 * H, 2 * W, C),
                         method="bilinear")
    return y.astype(x.dtype)


# ----------------------------------------------------------------------------
# Deterministic synthetic parameter init (shapes follow RefineResnet.__init__)
# ----------------------------------------------------------------------------
def _make_conv_param(key, cin, cout, k, stride, pad, act, bn):
    K = k * k * cin
    Kp = _round_up(K, 128)
    tk = _choose_tk(Kp)
    tn = 256 if cout >= 256 else 128
    Np = _round_up(cout, tn)

    kw_, kb_, kg, kbe, km, kv = jax.random.split(key, 6)
    fan_in = cin * k * k
    w = jax.random.normal(kw_, (cout, cin, k, k), jnp.float32) * math.sqrt(2.0 / fan_in)
    if bn:  # Conv(bias=False) + BatchNorm folded: scale = g/sqrt(v+eps), bias = b - m*scale
        gamma = 1.0 + 0.1 * jax.random.normal(kg, (cout,), jnp.float32)
        beta = 0.1 * jax.random.normal(kbe, (cout,), jnp.float32)
        mean = 0.05 * jax.random.normal(km, (cout,), jnp.float32)
        var = 0.9 + 0.2 * jax.random.uniform(kv, (cout,), jnp.float32)
        scale = gamma / jnp.sqrt(var + 1e-5)
        bias = beta - mean * scale
    else:   # plain Conv2d with bias
        scale = jnp.ones((cout,), jnp.float32)
        bias = 0.01 * jax.random.normal(kb_, (cout,), jnp.float32)

    # (Cout,Cin,KH,KW) -> (KH,KW,Cin,Cout) matches the im2col tap order; fold BN scale,
    # pre-pad to (Kp, Np) and store as bf16 once (no per-forward pad/transpose).
    wmat = jnp.transpose(w, (2, 3, 1, 0)).reshape(K, cout) * scale[None, :]
    wmat = jnp.pad(wmat, ((0, Kp - K), (0, Np - cout))).astype(jnp.bfloat16)
    bvec = jnp.pad(bias.reshape(1, cout), ((0, 0), (0, Np - cout))).astype(jnp.float32)

    cfg = dict(k=k, stride=stride, pad=pad, act=act, cin=cin, cout=cout,
               Kp=Kp, Np=Np, tk=tk, tn=tn)
    return cfg, dict(w=wmat, b=bvec)


def init_refine_resnet(key, num_blocks=(1, 1, 1, 1)):
    """Bottleneck blocks (expansion=4). Returns (static_cfg, weights_pytree)."""
    expansion = 4
    cfg, wts = {}, {}

    key, k0 = jax.random.split(key)
    cfg["conv1"], wts["conv1"] = _make_conv_param(k0, 3, 64, 7, 2, 3, "relu", bn=True)

    inplanes = 64
    layer_c, layer_w = [], []
    for planes, nb, stride in zip((64, 128, 256, 512), num_blocks, (1, 2, 2, 2)):
        blocks_c, blocks_w = [], []
        for bi in range(nb):
            s = stride if bi == 0 else 1
            key, ka, kb2, kc2, kd = jax.random.split(key, 5)
            bc, bw = {}, {}
            bc["conv1"], bw["conv1"] = _make_conv_param(ka, inplanes, planes, 1, 1, 0, "relu", bn=True)
            bc["conv2"], bw["conv2"] = _make_conv_param(kb2, planes, planes, 3, s, 1, "relu", bn=True)
            # conv3: BN only; the ReLU runs AFTER the residual add (fused in epilogue)
            bc["conv3"], bw["conv3"] = _make_conv_param(kc2, planes, planes * expansion, 1, 1, 0, "relu", bn=True)
            if s != 1 or inplanes != planes * expansion:
                bc["downsample"], bw["downsample"] = _make_conv_param(
                    kd, inplanes, planes * expansion, 1, s, 0, "none", bn=True)
            else:
                bc["downsample"], bw["downsample"] = None, None
            blocks_c.append(bc)
            blocks_w.append(bw)
            inplanes = planes * expansion
        layer_c.append(blocks_c)
        layer_w.append(blocks_w)
    cfg["layers"], wts["layers"] = layer_c, layer_w

    inchannel = expansion * 512                       # 2048
    key, ks = jax.random.split(key)
    cfg["smooth1"], wts["smooth1"] = _make_conv_param(ks, inchannel, 512, 3, 1, 1, "none", bn=False)

    extras_spec = [(inchannel, 256, 1, 1, 0), (256, 256, 3, 2, 1),
                   (256, 128, 1, 1, 0), (128, 256, 3, 2, 1)]
    ec, ew = [], []
    for (ci, co, kk, ss, pp) in extras_spec:
        key, ke = jax.random.split(key)
        c_, w_ = _make_conv_param(ke, ci, co, kk, ss, pp, "relu", bn=False)
        ec.append(c_)
        ew.append(w_)
    cfg["extras"], wts["extras"] = ec, ew

    # FpnAdapter([512, 1024, 512, 256], 4)
    fpn_block = (expansion * 128, expansion * 256, 512, 256)
    tc, tw, lc, lw = [], [], [], []
    for i in range(4):
        key, k1, k2, k3 = jax.random.split(key, 4)
        c_a, w_a = _make_conv_param(k1, fpn_block[i], 256, 3, 1, 1, "relu", bn=False)
        c_b, w_b = _make_conv_param(k2, 256, 256, 3, 1, 1, "none", bn=False)
        c_l, w_l = _make_conv_param(k3, 256, 256, 3, 1, 1, "relu", bn=False)
        tc.append((c_a, c_b))
        tw.append((w_a, w_b))
        lc.append(c_l)
        lw.append(w_l)
    cfg["fpn"] = {"trans": tc, "latent": lc}
    wts["fpn"] = {"trans": tw, "latent": lw}
    return cfg, wts


# ----------------------------------------------------------------------------
# Forward pass (matches RefineResnet.forward + FpnAdapter.forward)
# ----------------------------------------------------------------------------
def _bottleneck_forward(x, bw, bc):
    identity = x
    out = apply_conv(x, bw["conv1"], bc["conv1"])
    out = apply_conv(out, bw["conv2"], bc["conv2"])
    if bc["downsample"] is not None:
        identity = apply_conv(x, bw["downsample"], bc["downsample"])
    # residual add + ReLU fused into the conv3 epilogue
    return apply_conv(out, bw["conv3"], bc["conv3"], residual=identity)


def _fpn_forward(fcfg, fwts, sources):
    x = sources[:4]
    trans = []
    for i in range(4):
        t = apply_conv(x[i], fwts["trans"][i][0], fcfg["trans"][i][0])   # conv+ReLU
        t = apply_conv(t, fwts["trans"][i][1], fcfg["trans"][i][1])      # conv
        trans.append(t)
    last = apply_conv(trans[-1], fwts["latent"][3], fcfg["latent"][3])   # conv+ReLU fused
    fpn_out = [last]
    up = upsample2x_bilinear(last)
    for i in range(2, -1, -1):
        q = jax.nn.relu(trans[i] + up)
        q = apply_conv(q, fwts["latent"][i], fcfg["latent"][i])          # conv+ReLU fused
        fpn_out.append(q)
        if i > 0:
            up = upsample2x_bilinear(q)
    return fpn_out[::-1]


def refine_resnet_forward(cfg, weights, x_nchw):
    x = jnp.transpose(x_nchw, (0, 2, 3, 1)).astype(jnp.bfloat16)   # NCHW -> NHWC bf16

    c1 = apply_conv(x, weights["conv1"], cfg["conv1"])             # conv1+BN+ReLU fused
    c1 = maxpool_3x3_s2_p1(c1)

    feats = c1
    stage_outs = []
    for li in range(4):
        for bc, bw in zip(cfg["layers"][li], weights["layers"][li]):
            feats = _bottleneck_forward(feats, bw, bc)
        stage_outs.append(feats)
    _c2, c3, c4, c5 = stage_outs

    c5_ = apply_conv(c5, weights["smooth1"], cfg["smooth1"])       # no activation
    arm_sources = [c3, c4, c5_]

    xcur = c5
    for k in range(4):
        xcur = apply_conv(xcur, weights["extras"][k], cfg["extras"][k])   # conv+ReLU fused
        if k % 2 == 1:
            arm_sources.append(xcur)

    odm_sources = _fpn_forward(cfg["fpn"], weights["fpn"], arm_sources)

    arm = [jnp.transpose(a, (0, 3, 1, 2)).astype(jnp.float32) for a in arm_sources]
    odm = [jnp.transpose(o, (0, 3, 1, 2)).astype(jnp.float32) for o in odm_sources]
    return arm, odm


# ----------------------------------------------------------------------------
# Lightweight correctness check of one fused conv against lax.conv
# ----------------------------------------------------------------------------
def _check_conv(cfg_c, wts_c, x_nhwc):
    y = apply_conv(x_nhwc, wts_c, cfg_c).astype(jnp.float32)
    k, s, p = cfg_c["k"], cfg_c["stride"], cfg_c["pad"]
    cin, cout = cfg_c["cin"], cfg_c["cout"]
    w = wts_c["w"][:k * k * cin, :cout].astype(jnp.float32).reshape(k, k, cin, cout)
    ref = jax.lax.conv_general_dilated(
        x_nhwc.astype(jnp.float32), w, (s, s), [(p, p), (p, p)],
        dimension_numbers=("NHWC", "HWIO", "NHWC"))
    ref = ref + wts_c["b"][0, :cout]
    if cfg_c["act"] == "relu":
        ref = jnp.maximum(ref, 0.0)
    err = jnp.max(jnp.abs(y - ref)) / (jnp.max(jnp.abs(ref)) + 1e-6)
    assert float(err) < 2e-2, f"fused conv mismatch: rel_err={float(err)}"


# ----------------------------------------------------------------------------
if __name__ == "__main__":
    key = jax.random.PRNGKey(0)
    pkey, xkey, ckey = jax.random.split(key, 3)

    cfg, weights = init_refine_resnet(pkey, num_blocks=(1, 1, 1, 1))

    # small but architecture-consistent input: batch=2, 3 channels, 64x64
    x = jax.random.normal(xkey, (2, 3, 64, 64), jnp.float32)

    # sanity-check the fused Pallas conv against lax.conv on two layers
    _check_conv(cfg["conv1"], weights["conv1"],
                jnp.transpose(x, (0, 2, 3, 1)).astype(jnp.bfloat16))
    x_small = jax.random.normal(ckey, (2, 4, 4, 256), jnp.float32).astype(jnp.bfloat16)
    _check_conv(cfg["extras"][1], weights["extras"][1], x_small)

    fwd = jax.jit(functools.partial(refine_resnet_forward, cfg))
    arm, odm = fwd(weights, x)
    arm = [jax.block_until_ready(a) for a in arm]
    odm = [jax.block_until_ready(o) for o in odm]

    expected_arm = [(2, 512, 8, 8), (2, 1024, 4, 4), (2, 512, 2, 2),
                    (2, 256, 1, 1), (2, 256, 1, 1)]
    expected_odm = [(2, 256, 8, 8), (2, 256, 4, 4), (2, 256, 2, 2), (2, 256, 1, 1)]
    assert [tuple(a.shape) for a in arm] == expected_arm, [tuple(a.shape) for a in arm]
    assert [tuple(o.shape) for o in odm] == expected_odm, [tuple(o.shape) for o in odm]
    assert all(bool(jnp.all(jnp.isfinite(a))) for a in arm + odm)

    print("KERNEL_OK")
</pallas_src>

<mosaic_0001>
module attributes {stable_mosaic.version = 11 : i64} {
  func.func @kernel(%arg0: i32, %arg1: i32, %arg2: i32, %arg3: memref<512x256xbf16, #tpu.memory_space<vmem>>, %arg4: memref<256x128xbf16, #tpu.memory_space<vmem>>, %arg5: memref<1x128xf32, #tpu.memory_space<vmem>>, %arg6: memref<512x128xbf16, #tpu.memory_space<vmem>>, %arg7: memref<512x128xf32, #tpu.memory_space<vmem>>) attributes {dimension_semantics = [#tpu.dimension_semantics<parallel>, #tpu.dimension_semantics<parallel>, #tpu.dimension_semantics<arbitrary>], iteration_bounds = array<i64: 4, 1, 1>, scalar_prefetch = 0 : i64, scratch_operands = 1 : i64, tpu.core_type = #tpu.core_type<tc>, window_params = [{transform_indices = @transform_0, window_bounds = array<i64: 512, 256>}, {transform_indices = @transform_1, window_bounds = array<i64: 256, 128>}, {transform_indices = @transform_2, window_bounds = array<i64: 1, 128>}, {transform_indices = @transform_3, window_bounds = array<i64: 512, 128>}]} {
    %c0_i32 = arith.constant 0 : i32
    %0 = arith.cmpi eq, %arg2, %c0_i32 : i32
    %1 = arith.extui %0 : i1 to i32
    %c0_i32_0 = arith.constant 0 : i32
    %2 = arith.cmpi ne, %1, %c0_i32_0 : i32
    scf.if %2 {
      %cst_10 = arith.constant 0.000000e+00 : f32
      %12 = vector.broadcast %cst_10 : f32 to vector<512x128xf32>
      %c0_11 = arith.constant 0 : index
      %c0_12 = arith.constant 0 : index
      %13 = vector.load %arg7[%c0_11, %c0_12] : memref<512x128xf32, #tpu.memory_space<vmem>>, vector<512x128xf32>
      tpu.vector_store %arg7[%c0_11, %c0_12], %12 {strides = array<i32>} : memref<512x128xf32, #tpu.memory_space<vmem>>, vector<512x128xf32>,
    } else {
    }
    %c0 = arith.constant 0 : index
    %c0_1 = arith.constant 0 : index
    %3 = vector.load %arg7[%c0, %c0_1] : memref<512x128xf32, #tpu.memory_space<vmem>>, vector<512x128xf32>
    %c0_2 = arith.constant 0 : index
    %c0_3 = arith.constant 0 : index
    %4 = vector.load %arg3[%c0_2, %c0_3] : memref<512x256xbf16, #tpu.memory_space<vmem>>, vector<512x256xbf16>
    %c0_4 = arith.constant 0 : index
    %c0_5 = arith.constant 0 : index
    %5 = vector.load %arg4[%c0_4, %c0_5] : memref<256x128xbf16, #tpu.memory_space<vmem>>, vector<256x128xbf16>
    %cst = arith.constant dense<0.000000e+00> : vector<512x128xf32>
    %6 = tpu.matmul %4, %5, %cst {dimension_numbers = #tpu.dot_dimension_numbers<[1], [0], [0], [1], [0, 0, 1, 1], [], []>} : vector<512x256xbf16>, vector<256x128xbf16>, vector<512x128xf32> -> vector<512x128xf32>
    %7 = arith.addf %3, %6 : vector<512x128xf32>
    %c0_6 = arith.constant 0 : index
    %c0_7 = arith.constant 0 : index
    %8 = vector.load %arg7[%c0_6, %c0_7] : memref<512x128xf32, #tpu.memory_space<vmem>>, vector<512x128xf32>
    tpu.vector_store %arg7[%c0_6, %c0_7], %7 {strides = array<i32>} : memref<512x128xf32, #tpu.memory_space<vmem>>, vector<512x128xf32>,
    %c0_i32_8 = arith.constant 0 : i32
    %9 = arith.cmpi eq, %arg2, %c0_i32_8 : i32
    %10 = arith.extui %9 : i1 to i32
    %c0_i32_9 = arith.constant 0 : i32
    %11 = arith.cmpi ne, %10, %c0_i32_9 : i32
    scf.if %11 {
      %c0_10 = arith.constant 0 : index
      %c0_11 = arith.constant 0 : index
      %12 = vector.load %arg7[%c0_10, %c0_11] : memref<512x128xf32, #tpu.memory_space<vmem>>, vector<512x128xf32>
      %c0_12 = arith.constant 0 : index
      %c0_13 = arith.constant 0 : index
      %13 = vector.load %arg5[%c0_12, %c0_13] : memref<1x128xf32, #tpu.memory_space<vmem>>, vector<1x128xf32>
      %14 = vector.broadcast %13 : vector<1x128xf32> to vector<512x128xf32>
      %15 = arith.addf %12, %14 : vector<512x128xf32>
      %cst_14 = arith.constant 0.000000e+00 : f32
      %16 = vector.broadcast %cst_14 : f32 to vector<512x128xf32>
      %17 = arith.maximumf %15, %16 : vector<512x128xf32>
      %18 = arith.truncf %17 : vector<512x128xf32> to vector<512x128xbf16>
      %c0_15 = arith.constant 0 : index
      %c0_16 = arith.constant 0 : index
      %19 = vector.load %arg6[%c0_15, %c0_16] : memref<512x128xbf16, #tpu.memory_space<vmem>>, vector<512x128xbf16>
      tpu.vector_store %arg6[%c0_15, %c0_16], %18 {strides = array<i32>} : memref<512x128xbf16, #tpu.memory_space<vmem>>, vector<512x128xbf16>,
    } else {
    }
    return
  }
  func.func @transform_0(%arg0: i32, %arg1: i32, %arg2: i32) -> (i32, i32) {
    %c0_i32 = arith.constant 0 : i32
    return %arg0, %arg2 : i32, i32
  }
  func.func @transform_1(%arg0: i32, %arg1: i32, %arg2: i32) -> (i32, i32) {
    %c0_i32 = arith.constant 0 : i32
    return %arg2, %arg1 : i32, i32
  }
  func.func @transform_2(%arg0: i32, %arg1: i32, %arg2: i32) -> (i32, i32) {
    %c0_i32 = arith.constant 0 : i32
    %c0_i32_0 = arith.constant 0 : i32
    return %c0_i32, %arg1 : i32, i32
  }
  func.func @transform_3(%arg0: i32, %arg1: i32, %arg2: i32) -> (i32, i32) {
    %c0_i32 = arith.constant 0 : i32
    return %arg0, %arg1 : i32, i32
  }
}

</mosaic_0001>

<bundles_post_ra>
// kernel: tpu_custom_call.1
= control target key start
LH: loop header
LB: loop body
LE: loop exit
PB: predicated region body
PF: predicated region fallthrough
CT: control target
= control target key end

     0   :  { %8 = vsyncpa [#allocation4], 0  ;;  %s3171_s0 = inlined_call_operand.hbm [shape: bf16[2048,256], index: 0, kind: input, shape index: {}]   ;;  %s3172_s1 = inlined_call_operand.hbm [shape: bf16[256,128], index: 1, kind: input, shape index: {}]   ;;  %s3173_s2 = inlined_call_operand.vmem [shape: f32[1,128], index: 2, kind: input, shape index: {}]   ;;  %s3174_s3 = inlined_call_operand.hbm [shape: bf16[2048,128], index: 3, kind: output, shape index: {}]  }
   0x1   :  { %10 = vsyncpa [#allocation4 + $0x1], 0 }
   0x2   :  { %11 = vsyncpa [#allocation7], 0 }
   0x3   :  { %12 = vsyncpa [#allocation5], 0 }
   0x4   :  { %14 = vsyncpa [#allocation5 + $0x1], 0  ;;  %s2789_s12 = smov 0   ;;  %s2791_s13 = smov 0  }
   0x5   :  { %s2793_s14 = smov 0   ;;  %s2795_s15 = smov 0  }
   0x6   :  { %s2797_s16 = smov 0   ;;  %s2799_s17 = smov 0  }
   0x7 LB: > { %s1973_s18 = sadd.s32 4294967295, %s2757_s17   ;;  %s1974_s19 = sadd.s32 4294967294, %s2757_s17   ;;  %s2757_s17 = sphi %s2799_s17, %s20_s17   ;;  %s2753_s16 = sphi %s2797_s16, %s3191_s16   ;;  %s2749_s15 = sphi %s2795_s15, %s3190_s15   ;;  %s2745_s14 = sphi %s2793_s14, %s3189_s14   ;;  %s2741_s13 = sphi %s2791_s13, %s3188_s13   ;;  %s2737_s12 = sphi %s2789_s12, %s3187_s12  }
   0x8   : > { %p61_p0 = scmp.ne.s32.totalorder %s2741_s13, %s2737_s12  ;;  %p2823_p1 = scmp.eq.s32.totalorder %s1973_s18, 0 }
   0x9   : > { %p2827_p2 = scmp.eq.s32.totalorder %s1973_s18, 3  ;;  %p147_p3 = scmp.eq.s32.totalorder %s1974_s19, 3 }
   0xa   : > { %p2833_p4 = por %p2823_p1, %p61_p0  ;;  %p1975_p5 = scmp.ge.s32.totalorder %s2757_s17, 1 }
   0xb   : > { %p2838_p6 = por %p147_p3, %p61_p0  ;;  %p154_p7 = scmp.lt.s32.totalorder %s2757_s17, 5 }
   0xc   : > { %s2759_s25 = smov [#allocation6]   ;;  %s39_s28 = sadd.s32 1, %s2753_s16 }
   0xd   : > { %s3179_s23 = scalar_select %p2838_p6, 1, 0 }
   0xe   : > { %p2843_p8 = pnand %p1975_p5, %p154_p7  ;;  %s170_s26 = sshll.u32 %s2759_s25, 4  ;;  %s171_s26 = int_to_ptr.vmem [resolvable:$true] %s170_s26 }
   0xf   : > { %s2630_s29 = scalar_lea.vmem %s171_s26, 2048  ;;  %p2638_p3 = scmp.lt.s32.totalorder %s171_s26, %s171_s26 }
  0x10   : > { %p2435_p9 = pneg %p2843_p8  ;;  %p2631_p12 = scmp.ne.s32.totalorder %s171_s26, %s2630_s29 }
  0x11   : > { %p2639_p5 = scmp.lt.s32.totalorder %s2630_s29, %s2630_s29 }
  0x12   : > { %p2851_p10 = pnand %p2435_p9, %p2823_p1 }
  0x13   : > { %p2640_p7 = por %p2639_p5, %p2638_p3 }
  0x14   : > { %p2621_p11 = pneg %p2851_p10 }
  0x16   : > { %p2633_p13 = pnand %p2631_p12, %p2621_p11 }
  0x18   : > { %p2634_p0 = pneg %p2633_p13 }
  0x1a   : > { %p2641_p6 = pnand %p2640_p7, %p2634_p0 }
  0x1c   : > { %2644 = shalt.err (!%p2641_p6)
}
  0x1d   : > { %s2760_s30 = smov 64   ;;  %s2761_s4 = smov 4  }
  0x1e   : > { %2438 = dma.hbm_to_vmem [thread:$0]  (!%p2851_p10), %s3172_s1, 2048, %s171_s26, [#allocation7], %s2760_s30, %s2760_s30, %s2761_s4  }
  0x1f   : > { %p41_p9 = scmp.ge.s32.totalorder %s39_s28, 4  ;;  %s48_s7 = sadd.s32 1, %s2745_s14 }
  0x20   : > { %p55_p6 = scmp.ne.s32.totalorder %s2745_s14, %s2741_s13  ;;  %p56_p11 = scmp.eq.s32.totalorder %s2757_s17, 0 }
  0x21   : > { %s3193_s28 = smov (%p41_p9, %s39_s28), 0  ;;  %p2448_p0 = scmp.lt.s32.totalorder %s2757_s17, 4 }
  0x22   : > { %p2869_p12 = por %p56_p11, %p55_p6  ;;  %p2875_p13 = por %p2827_p2, %p55_p6 }
  0x23   : > { %s43_s10 = ssub.s32 %s2753_s16, %s3193_s28  ;;  %s190_s11 = sand.u32 1, %s2745_s14  }
  0x24   : > { %s3183_s9 = scalar_select %p2875_p13, 1, 0 }
  0x25   : > { %p46_p10 = scmp.eq.s32.totalorder %s43_s10, 0  ;;  %s1979_s18 = sshll.u32 %s190_s11, 9 }
  0x26   : > { %s2138_s25 = sshll.u32 %s2753_s16, 13  ;;  %s194_s30 = scalar_lea.vmem [#allocation3], %s1979_s18 }
  0x27   : > { %s2884_s19 = scalar_select %p46_p10, %s2745_s14, %s48_s7  }
  0x28   : > { %s203_s29 = scalar_lea.hbm %s3171_s0, %s2138_s25  ;;  %s204_s4 = sshll.u32 %s194_s30, 4  ;;  %s205_s4 = int_to_ptr.vmem [resolvable:$true] %s204_s4 }
  0x29   : > { %p2892_p2 = pnand %p2448_p0, %p2869_p12  ;;  %s191_s5 = scalar_lea.sflag [#allocation4], %s190_s11 }
  0x2a   : > { %s2658_s6 = scalar_lea.vmem %s205_s4, 8192  ;;  %s2762_s7 = smov [#allocation3]  }
  0x2b   : > { %p2647_p3 = pneg %p2892_p2  ;;  %p2659_p5 = scmp.ne.s32.totalorder %s205_s4, %s2658_s6 }
  0x2c   : > { %s2663_s10 = sshll.u32 %s2762_s7, 4  ;;  %s2664_s10 = int_to_ptr.vmem [resolvable:$false] %s2663_s10 }
  0x2d   : > { %p2661_p7 = pnand %p2659_p5, %p2647_p3  ;;  %s2665_s25 = scalar_lea.vmem %s2664_s10, 16384 }
  0x2e   : > { %p2666_p6 = scmp.lt.s32.totalorder %s205_s4, %s2664_s10  ;;  %p2667_p11 = scmp.lt.s32.totalorder %s2665_s25, %s2658_s6 }
  0x2f   : > { %p2662_p9 = pneg %p2661_p7 }
  0x30   : > { %p2668_p10 = por %p2667_p11, %p2666_p6 }
  0x32   : > { %p2669_p13 = pnand %p2668_p10, %p2662_p9 }
  0x34   : > { %2672 = shalt.err (!%p2669_p13)
}
  0x35   : > { %s2763_s8 = smov 128   ;;  %s2764_s18 = smov 8  }
  0x36   : > { %2442 = dma.hbm_to_vmem [thread:$0]  (!%p2892_p2), %s203_s29, 8192, %s205_s4, %s191_s5, %s2763_s8, %s2763_s8, %s2764_s18  }
  0x37   : > { %216 = sbr.rel (%p2843_p8) target bundleno = 465 (0x1d1), region = 32  ;;  %s2903_s11 = sand.u32 (!%p2843_p8), 1, %s2741_s13  }
  0x38   : > { %s1984_s26 = sshll.u32 (!%p2843_p8), %s2903_s11, 9  ;;  %s219_s27 = scalar_lea.sflag (!%p2843_p8), [#allocation4], %s2903_s11 }
  0x39   : > { %s2907_s30 = scalar_lea.vmem (!%p2843_p8), [#allocation3], %s1984_s26 }
  0x3c   : > { %2724 = dma.done.wait (%p2833_p4), %s219_s27, 8192  }
  0x3d   : > { %2726 = vsyncadd (%p2833_p4), %s219_s27, 4294959104 }
  0x3e   : > { %2728 = dma.done.wait (%p2823_p1), [#allocation7], 2048  }
  0x3f   : > { %2730 = vsyncadd (%p2823_p1), [#allocation7], 4294965248  ;;  %v2765_v0 = vmov 0   ;;  %v2507_v1 = vld [vmem:[#allocation6 + $0x38] sm:$0xff]   ;;  %v2508_v2 = vld [vmem:[#allocation6 + $0x30] sm:$0xff]   ;;  %s1986_s24 = sshll.u32 %s2903_s11, 8 }
  0x40   : > { %904 = vmatprep.subr.bf16.mxu0 %v2765_v0  ;;  %2395 = vmatprep.subr.bf16.mxu1 %v2765_v0  ;;  %v2509_v3 = vld [vmem:[#allocation6 + $0x28] sm:$0xff]   ;;  %v2510_v4 = vld [vmem:[#allocation6 + $0x20] sm:$0xff]   ;;  %v2511_v5 = vld [vmem:[#allocation6 + $0x18] sm:$0xff]   ;;  %s3023_s29 = scalar_lea.vmem [#allocation8], %s1986_s24  ;;  %s2203_s4 = sshll.u32 %s2749_s15, 12 }
  0x41   : > { %905 = vmatpush1.bf16.msra.mxu0 %v2507_v1  ;;  %2411 = vmatpush1.bf16.msra.mxu1 %v2507_v1  ;;  %v2525_v6 = vld [vmem:[%s2907_s30 + $0x4] ss:$8 sps:$4 sm:$0xff]   ;;  %v2512_v7 = vld [vmem:[#allocation6 + $0x10] sm:$0xff]   ;;  %v2515_v11 = vld [vmem:[#allocation6 + $0x78] sm:$0xff]   ;;  %s1858_s21 = sshll.u32 %s3023_s29, 4  ;;  %s3120_s7 = scalar_lea.hbm %s3174_s3, %s2203_s4  ;;  %s3122_s21 = int_to_ptr.vmem [resolvable:$true] %s1858_s21 }
  0x42   : > { %906 = vmatprep.subr.bf16.mxu0 %v2765_v0  ;;  %2396 = vmatprep.subr.bf16.mxu1 %v2765_v0  ;;  %v2528_v8 = vld [vmem:[%s2907_s30 + $0x104] ss:$8 sps:$4 sm:$0xff]   ;;  %v2516_v12 = vld [vmem:[#allocation6 + $0x70] sm:$0xff]   ;;  %v2519_v15 = vld [vmem:[#allocation6 + $0x58] sm:$0xff]   ;;  %s1844_s15 = scalar_lea.sflag [#allocation5], %s2903_s11  ;;  %s2673_s10 = scalar_lea.vmem %s3122_s21, 4096 }
  0x43   : > { %936 = vmatprep.mubr.bf16.mxu0 %v2525_v6  ;;  %1064 = vmatprep.mubr.bf16.mxu1 %v2528_v8  ;;  %v2513_v9 = vld [vmem:[#allocation6 + $0x8] sm:$0xff]   ;;  %v2514_v10 = vld [vmem:[#allocation6] sm:$0xff]   ;;  %v2520_v16 = vld [vmem:[#allocation6 + $0x50] sm:$0xff]   ;;  %p2674_p1 = scmp.ne.s32.totalorder %s3122_s21, %s2673_s10  ;;  %p3185_p4 = scmp.ne.s32.totalorder %s3183_s9, 0 }
  0x44   : > { %v2517_v13 = vld [vmem:[#allocation6 + $0x68] sm:$0xff]   ;;  %v2518_v14 = vld [vmem:[#allocation6 + $0x60] sm:$0xff]   ;;  %v2529_v21 = vld [vmem:[%s2907_s30 + $0x14] ss:$8 sps:$4 sm:$0xff]   ;;  %s2766_s25 = smov [#allocation8]  }
  0x45   : > { %907 = vmatpush1.bf16.msra.mxu0 %v2508_v2  ;;  %2412 = vmatpush1.bf16.msra.mxu1 %v2508_v2  ;;  %v2521_v17 = vld [vmem:[#allocation6 + $0x48] sm:$0xff]   ;;  %v2522_v18 = vld [vmem:[#allocation6 + $0x40] sm:$0xff]   ;;  %v2531_v22 = vld [vmem:[%s2907_s30 + $0x114] ss:$8 sps:$4 sm:$0xff]   ;;  %p2675_p8 = pnand %p2674_p1, %p3185_p4  ;;  %s2677_s8 = sshll.u32 %s2766_s25, 4  ;;  %s2678_s8 = int_to_ptr.vmem [resolvable:$false] %s2677_s8 }
  0x46   : > { %908 = vmatprep.subr.bf16.mxu0 %v2765_v0  ;;  %2397 = vmatprep.subr.bf16.mxu1 %v2765_v0  ;;  %v2523_v19 = vld [vmem:[%s2907_s30] ss:$8 sps:$4 sm:$0xff]   ;;  %v2533_v23 = vld [vmem:[%s2907_s30 + $0x10] ss:$8 sps:$4 sm:$0xff]   ;;  %v2535_v25 = vld [vmem:[%s2907_s30 + $0x24] ss:$8 sps:$4 sm:$0xff]   ;;  %p2680_p13 = scmp.lt.s32.totalorder %s3122_s21, %s2678_s8 }
  0x47   : > { %v2526_v20 = vld [vmem:[%s2907_s30 + $0x100] ss:$8 sps:$4 sm:$0xff]   ;;  %v2534_v24 = vld [vmem:[%s2907_s30 + $0x110] ss:$8 sps:$4 sm:$0xff]   ;;  %v2537_v26 = vld [vmem:[%s2907_s30 + $0x124] ss:$8 sps:$4 sm:$0xff]   ;;  %p2676_p12 = pneg %p2675_p8 }
  0x48   : > { %v2539_v27 = vld [vmem:[%s2907_s30 + $0x20] ss:$8 sps:$4 sm:$0xff]   ;;  %v2541_v29 = vld [vmem:[%s2907_s30 + $0x34] ss:$8 sps:$4 sm:$0xff]   ;;  %v2545_v31 = vld [vmem:[%s2907_s30 + $0x30] ss:$8 sps:$4 sm:$0xff]  }
  0x49   : > { %909 = vmatpush1.bf16.msra.mxu0 %v2509_v3  ;;  %2413 = vmatpush1.bf16.msra.mxu1 %v2509_v3  ;;  %v2540_v28 = vld [vmem:[%s2907_s30 + $0x120] ss:$8 sps:$4 sm:$0xff]   ;;  %v2543_v30 = vld [vmem:[%s2907_s30 + $0x134] ss:$8 sps:$4 sm:$0xff]   ;;  %v2546_v32 = vld [vmem:[%s2907_s30 + $0x130] ss:$8 sps:$4 sm:$0xff]  }
  0x4a   : > { %910 = vmatprep.subr.bf16.mxu0 %v2765_v0  ;;  %2398 = vmatprep.subr.bf16.mxu1 %v2765_v0  ;;  %v2547_v33 = vld [vmem:[%s2907_s30 + $0x44] ss:$8 sps:$4 sm:$0xff]   ;;  %v2551_v35 = vld [vmem:[%s2907_s30 + $0x40] ss:$8 sps:$4 sm:$0xff]   ;;  %v2553_v37 = vld [vmem:[%s2907_s30 + $0x54] ss:$8 sps:$4 sm:$0xff]  }
  0x4b   : > { %v2549_v34 = vld [vmem:[%s2907_s30 + $0x144] ss:$8 sps:$4 sm:$0xff]   ;;  %v2552_v36 = vld [vmem:[%s2907_s30 + $0x140] ss:$8 sps:$4 sm:$0xff]   ;;  %v2555_v38 = vld [vmem:[%s2907_s30 + $0x154] ss:$8 sps:$4 sm:$0xff]  }
  0x4c   : > { %v2557_v39 = vld [vmem:[%s2907_s30 + $0x50] ss:$8 sps:$4 sm:$0xff]   ;;  %v2559_v41 = vld [vmem:[%s2907_s30 + $0x64] ss:$8 sps:$4 sm:$0xff]   ;;  %v2563_v43 = vld [vmem:[%s2907_s30 + $0x60] ss:$8 sps:$4 sm:$0xff]  }
  0x4d   : > { %911 = vmatpush1.bf16.msra.mxu0 %v2510_v4  ;;  %2414 = vmatpush1.bf16.msra.mxu1 %v2510_v4  ;;  %v2558_v40 = vld [vmem:[%s2907_s30 + $0x150] ss:$8 sps:$4 sm:$0xff]   ;;  %v2561_v42 = vld [vmem:[%s2907_s30 + $0x164] ss:$8 sps:$4 sm:$0xff]   ;;  %v2564_v44 = vld [vmem:[%s2907_s30 + $0x160] ss:$8 sps:$4 sm:$0xff]  }
  0x4e   : > { %912 = vmatprep.subr.bf16.mxu0 %v2765_v0  ;;  %2399 = vmatprep.subr.bf16.mxu1 %v2765_v0  ;;  %v2565_v45 = vld [vmem:[%s2907_s30 + $0x74] ss:$8 sps:$4 sm:$0xff]   ;;  %v2569_v47 = vld [vmem:[%s2907_s30 + $0x70] ss:$8 sps:$4 sm:$0xff]   ;;  %v2571_v49 = vld [vmem:[%s2907_s30 + $0x84] ss:$8 sps:$4 sm:$0xff]  }
  0x4f   : > { %v2567_v46 = vld [vmem:[%s2907_s30 + $0x174] ss:$8 sps:$4 sm:$0xff]   ;;  %v2570_v48 = vld [vmem:[%s2907_s30 + $0x170] ss:$8 sps:$4 sm:$0xff]   ;;  %v2573_v50 = vld [vmem:[%s2907_s30 + $0x184] ss:$8 sps:$4 sm:$0xff]  }
  0x50   : > { %v2575_v51 = vld [vmem:[%s2907_s30 + $0x80] ss:$8 sps:$4 sm:$0xff]   ;;  %v2577_v53 = vld [vmem:[%s2907_s30 + $0x94] ss:$8 sps:$4 sm:$0xff]   ;;  %v2581_v55 = vld [vmem:[%s2907_s30 + $0x90] ss:$8 sps:$4 sm:$0xff]  }
  0x51   : > { %913 = vmatpush1.bf16.msra.mxu0 %v2511_v5  ;;  %2415 = vmatpush1.bf16.msra.mxu1 %v2511_v5  ;;  %v2576_v52 = vld [vmem:[%s2907_s30 + $0x180] ss:$8 sps:$4 sm:$0xff]   ;;  %v2579_v54 = vld [vmem:[%s2907_s30 + $0x194] ss:$8 sps:$4 sm:$0xff]   ;;  %v2582_v56 = vld [vmem:[%s2907_s30 + $0x190] ss:$8 sps:$4 sm:$0xff]  }
  0x52   : > { %914 = vmatprep.subr.bf16.mxu0 %v2765_v0  ;;  %2400 = vmatprep.subr.bf16.mxu1 %v2765_v0  ;;  %v2583_v57 = vld [vmem:[%s2907_s30 + $0xa4] ss:$8 sps:$4 sm:$0xff]   ;;  %v2587_v59 = vld [vmem:[%s2907_s30 + $0xa0] ss:$8 sps:$4 sm:$0xff]   ;;  %v2589_v61 = vld [vmem:[%s2907_s30 + $0xb4] ss:$8 sps:$4 sm:$0xff]  }
  0x53   : > { %v2585_v58 = vld [vmem:[%s2907_s30 + $0x1a4] ss:$8 sps:$4 sm:$0xff]   ;;  %v2588_v60 = vld [vmem:[%s2907_s30 + $0x1a0] ss:$8 sps:$4 sm:$0xff]   ;;  %v2591_v62 = vld [vmem:[%s2907_s30 + $0x1b4] ss:$8 sps:$4 sm:$0xff]  }
  0x54   : > { %v2593_v63 = vld [vmem:[%s2907_s30 + $0xb0] ss:$8 sps:$4 sm:$0xff]   ;;  %v2595_v1 = vld [vmem:[%s2907_s30 + $0xc4] ss:$8 sps:$4 sm:$0xff]   ;;  %v2599_v3 = vld [vmem:[%s2907_s30 + $0xc0] ss:$8 sps:$4 sm:$0xff]  }
  0x55   : > { %915 = vmatpush1.bf16.msra.mxu0 %v2512_v7  ;;  %2416 = vmatpush1.bf16.msra.mxu1 %v2512_v7  ;;  %v2597_v2 = vld [vmem:[%s2907_s30 + $0x1c4] ss:$8 sps:$4 sm:$0xff]   ;;  %v2600_v4 = vld [vmem:[%s2907_s30 + $0x1c0] ss:$8 sps:$4 sm:$0xff]   ;;  %v2601_v5 = vld [vmem:[%s2907_s30 + $0xd4] ss:$8 sps:$4 sm:$0xff]  }
  0x56   : > { %916 = vmatprep.subr.bf16.mxu0 %v2765_v0  ;;  %2401 = vmatprep.subr.bf16.mxu1 %v2765_v0  ;;  %v2603_v6 = vld [vmem:[%s2907_s30 + $0x1d4] ss:$8 sps:$4 sm:$0xff]   ;;  %v2605_v7 = vld [vmem:[%s2907_s30 + $0xd0] ss:$8 sps:$4 sm:$0xff]   ;;  %s2679_s18 = scalar_lea.vmem %s2678_s8, 8192 }
  0x57   : > { %v2606_v8 = vld [vmem:[%s2907_s30 + $0x1d0] ss:$8 sps:$4 sm:$0xff]   ;;  %p2681_p0 = scmp.lt.s32.totalorder %s2679_s18, %s2673_s10 }
  0x59   : > { %917 = vmatpush1.bf16.msra.mxu0 %v2513_v9  ;;  %2417 = vmatpush1.bf16.msra.mxu1 %v2513_v9  ;;  %v2607_v9 = vld [vmem:[%s2907_s30 + $0xe4] ss:$8 sps:$4 sm:$0xff]   ;;  %p2682_p2 = por %p2681_p0, %p2680_p13 }
  0x5a   : > { %918 = vmatprep.subr.bf16.mxu0 %v2765_v0  ;;  %2402 = vmatprep.subr.bf16.mxu1 %v2765_v0 }
  0x5b   : > { %p2683_p3 = pnand %p2682_p2, %p2676_p12 }
  0x5d   : > { %919 = vmatpush1.bf16.msra.mxu0 %v2514_v10  ;;  %2418 = vmatpush1.bf16.msra.mxu1 %v2514_v10  ;;  %v2609_v10 = vld [vmem:[%s2907_s30 + $0x1e4] ss:$8 sps:$4 sm:$0xff]  }
  0x5e   : > { %920 = vmatprep.subr.bf16.mxu0 %v2765_v0  ;;  %2403 = vmatprep.subr.bf16.mxu1 %v2765_v0 }
  0x61   : > { %921 = vmatpush2.bf16.msra.mxu0 %v2515_v11  ;;  %2419 = vmatpush2.bf16.msra.mxu1 %v2515_v11  ;;  %v2611_v11 = vld [vmem:[%s2907_s30 + $0xe0] ss:$8 sps:$4 sm:$0xff]  }
  0x62   : > { %922 = vmatprep.subr.bf16.mxu0 %v2765_v0  ;;  %2404 = vmatprep.subr.bf16.mxu1 %v2765_v0 }
  0x65   : > { %923 = vmatpush2.bf16.msra.mxu0 %v2516_v12  ;;  %2420 = vmatpush2.bf16.msra.mxu1 %v2516_v12  ;;  %v2612_v12 = vld [vmem:[%s2907_s30 + $0x1e0] ss:$8 sps:$4 sm:$0xff]  }
  0x66   : > { %924 = vmatprep.subr.bf16.mxu0 %v2765_v0  ;;  %2405 = vmatprep.subr.bf16.mxu1 %v2765_v0 }
  0x69   : > { %925 = vmatpush2.bf16.msra.mxu0 %v2517_v13  ;;  %2421 = vmatpush2.bf16.msra.mxu1 %v2517_v13  ;;  %v2613_v13 = vld [vmem:[%s2907_s30 + $0xf4] ss:$8 sps:$4 sm:$0xff]  }
  0x6a   : > { %926 = vmatprep.subr.bf16.mxu0 %v2765_v0  ;;  %2406 = vmatprep.subr.bf16.mxu1 %v2765_v0 }
  0x6d   : > { %927 = vmatpush2.bf16.msra.mxu0 %v2518_v14  ;;  %2422 = vmatpush2.bf16.msra.mxu1 %v2518_v14  ;;  %v2615_v14 = vld [vmem:[%s2907_s30 + $0x1f4] ss:$8 sps:$4 sm:$0xff]  }
  0x6e   : > { %928 = vmatprep.subr.bf16.mxu0 %v2765_v0  ;;  %2407 = vmatprep.subr.bf16.mxu1 %v2765_v0 }
  0x71   : > { %929 = vmatpush2.bf16.msra.mxu0 %v2519_v15  ;;  %2423 = vmatpush2.bf16.msra.mxu1 %v2519_v15  ;;  %v2617_v15 = vld [vmem:[%s2907_s30 + $0xf0] ss:$8 sps:$4 sm:$0xff]  }
  0x72   : > { %930 = vmatprep.subr.bf16.mxu0 %v2765_v0  ;;  %2408 = vmatprep.subr.bf16.mxu1 %v2765_v0 }
  0x75   : > { %931 = vmatpush2.bf16.msra.mxu0 %v2520_v16  ;;  %2424 = vmatpush2.bf16.msra.mxu1 %v2520_v16  ;;  %v2618_v16 = vld [vmem:[%s2907_s30 + $0x1f0] ss:$8 sps:$4 sm:$0xff]  }
  0x76   : > { %932 = vmatprep.subr.bf16.mxu0 %v2765_v0  ;;  %2409 = vmatprep.subr.bf16.mxu1 %v2765_v0 }
  0x79   : > { %933 = vmatpush2.bf16.msra.mxu0 %v2521_v17  ;;  %2425 = vmatpush2.bf16.msra.mxu1 %v2521_v17 }
  0x7a   : > { %934 = vmatprep.subr.bf16.mxu0 %v2765_v0  ;;  %2410 = vmatprep.subr.bf16.mxu1 %v2765_v0  ;;  %v2594_v0 = vld [vmem:[%s2907_s30 + $0x1b0] ss:$8 sps:$4 sm:$0xff]  }
  0x7d   : > { %935 = vmatpush2.bf16.msra.mxu0 %v2522_v18  ;;  %2426 = vmatpush2.bf16.msra.mxu1 %v2522_v18  ;;  %v3016_v18 = vld [vmem:[%s3173_s2] ss:$0 sm:$0xff] }
  0x80   : > { %937 = vmatmul.mubr.bf16.vlgmr.msra.gmra.mxu0 %v2523_v19  ;;  %1065 = vmatmul.mubr.bf16.vlgmr.msra.gmra.mxu1 %v2526_v20 }
  0x81   : > { %944 = vmatprep.mubr.bf16.mxu0 %v2529_v21  ;;  %1072 = vmatprep.mubr.bf16.mxu1 %v2531_v22 }
  0x88   : > { %945 = vmatmul.mubr.bf16.gmra.mxu0 %v2533_v23  ;;  %1073 = vmatmul.mubr.bf16.gmra.mxu1 %v2534_v24 }
  0x89   : > { %952 = vmatprep.mubr.bf16.mxu0 %v2535_v25  ;;  %1080 = vmatprep.mubr.bf16.mxu1 %v2537_v26 }
  0x90   : > { %953 = vmatmul.mubr.bf16.gmra.mxu0 %v2539_v27  ;;  %1081 = vmatmul.mubr.bf16.gmra.mxu1 %v2540_v28 }
  0x91   : > { %960 = vmatprep.mubr.bf16.mxu0 %v2541_v29  ;;  %1088 = vmatprep.mubr.bf16.mxu1 %v2543_v30 }
  0x98   : > { %961 = vmatmul.mubr.bf16.gmra.mxu0 %v2545_v31  ;;  %1089 = vmatmul.mubr.bf16.gmra.mxu1 %v2546_v32 }
  0x99   : > { %968 = vmatprep.mubr.bf16.mxu0 %v2547_v33  ;;  %1096 = vmatprep.mubr.bf16.mxu1 %v2549_v34 }
  0xa0   : > { %969 = vmatmul.mubr.bf16.gmra.mxu0 %v2551_v35  ;;  %1097 = vmatmul.mubr.bf16.gmra.mxu1 %v2552_v36 }
  0xa1   : > { %976 = vmatprep.mubr.bf16.mxu0 %v2553_v37  ;;  %1104 = vmatprep.mubr.bf16.mxu1 %v2555_v38 }
  0xa8   : > { %977 = vmatmul.mubr.bf16.gmra.mxu0 %v2557_v39  ;;  %1105 = vmatmul.mubr.bf16.gmra.mxu1 %v2558_v40 }
  0xa9   : > { %984 = vmatprep.mubr.bf16.mxu0 %v2559_v41  ;;  %1112 = vmatprep.mubr.bf16.mxu1 %v2561_v42 }
  0xb0   : > { %985 = vmatmul.mubr.bf16.gmra.mxu0 %v2563_v43  ;;  %1113 = vmatmul.mubr.bf16.gmra.mxu1 %v2564_v44 }
  0xb1   : > { %992 = vmatprep.mubr.bf16.mxu0 %v2565_v45  ;;  %1120 = vmatprep.mubr.bf16.mxu1 %v2567_v46 }
  0xb8   : > { %993 = vmatmul.mubr.bf16.gmra.mxu0 %v2569_v47  ;;  %1121 = vmatmul.mubr.bf16.gmra.mxu1 %v2570_v48 }
  0xb9   : > { %1000 = vmatprep.mubr.bf16.mxu0 %v2571_v49  ;;  %1128 = vmatprep.mubr.bf16.mxu1 %v2573_v50 }
  0xc0   : > { %1001 = vmatmul.mubr.bf16.gmra.mxu0 %v2575_v51  ;;  %1129 = vmatmul.mubr.bf16.gmra.mxu1 %v2576_v52 }
  0xc1   : > { %1008 = vmatprep.mubr.bf16.mxu0 %v2577_v53  ;;  %1136 = vmatprep.mubr.bf16.mxu1 %v2579_v54 }
  0xc8   : > { %1009 = vmatmul.mubr.bf16.gmra.mxu0 %v2581_v55  ;;  %1137 = vmatmul.mubr.bf16.gmra.mxu1 %v2582_v56 }
  0xc9   : > { %1016 = vmatprep.mubr.bf16.mxu0 %v2583_v57  ;;  %1144 = vmatprep.mubr.bf16.mxu1 %v2585_v58 }
  0xd0   : > { %1017 = vmatmul.mubr.bf16.gmra.mxu0 %v2587_v59  ;;  %1145 = vmatmul.mubr.bf16.gmra.mxu1 %v2588_v60 }
  0xd1   : > { %1024 = vmatprep.mubr.bf16.mxu0 %v2589_v61  ;;  %1152 = vmatprep.mubr.bf16.mxu1 %v2591_v62 }
  0xd8   : > { %1025 = vmatmul.mubr.bf16.gmra.mxu0 %v2593_v63  ;;  %1153 = vmatmul.mubr.bf16.gmra.mxu1 %v2594_v0 }
  0xd9   : > { %1032 = vmatprep.mubr.bf16.mxu0 %v2595_v1  ;;  %1160 = vmatprep.mubr.bf16.mxu1 %v2597_v2 }
  0xe0   : > { %1033 = vmatmul.mubr.bf16.gmra.mxu0 %v2599_v3  ;;  %1161 = vmatmul.mubr.bf16.gmra.mxu1 %v2600_v4 }
  0xe1   : > { %1040 = vmatprep.mubr.bf16.mxu0 %v2601_v5  ;;  %1168 = vmatprep.mubr.bf16.mxu1 %v2603_v6 }
  0xe8   : > { %1041 = vmatmul.mubr.bf16.gmra.mxu0 %v2605_v7  ;;  %1169 = vmatmul.mubr.bf16.gmra.mxu1 %v2606_v8 }
  0xe9   : > { %1048 = vmatprep.mubr.bf16.mxu0 %v2607_v9  ;;  %1176 = vmatprep.mubr.bf16.mxu1 %v2609_v10 }
  0xf0   : > { %1049 = vmatmul.mubr.bf16.gmra.mxu0 %v2611_v11  ;;  %1177 = vmatmul.mubr.bf16.gmra.mxu1 %v2612_v12 }
  0xf1   : > { %1056 = vmatprep.mubr.bf16.mxu0 %v2613_v13  ;;  %1184 = vmatprep.mubr.bf16.mxu1 %v2615_v14 }
  0xf8   : > { %1057 = vmatmul.mubr.bf16.gmra.mxu0 %v2617_v15  ;;  %1185 = vmatmul.mubr.bf16.gmra.mxu1 %v2618_v16 }
 0x140   : > { %v938_v17 = vpop.f32.mrf.mxu0  ;;  %v1066_v19 = vpop.f32.mrf.mxu1 }
 0x141   : > { %v1395_v22 = vadd.f32 %v3016_v18, %v938_v17  ;;  %v1427_v23 = vadd.f32 %v3016_v18, %v1066_v19 }
 0x142   : > { %v940_v20 = vpop.f32.mrf.mxu0  ;;  %v1068_v21 = vpop.f32.mrf.mxu1 }
 0x143   : > { %v1459_v30 = vmax.f32 %v1395_v22, 0.0  ;;  %v1491_v31 = vmax.f32 %v1427_v23, 0.0 }
 0x144   : > { %v941_v24 = vpop.f32.mrf.mxu0  ;;  %v1069_v25 = vpop.f32.mrf.mxu1 }
 0x145   : > { %v1396_v26 = vadd.f32 %v3016_v18, %v941_v24  ;;  %v1428_v27 = vadd.f32 %v3016_v18, %v1069_v25 }
 0x146   : > { %v943_v28 = vpop.f32.mrf.mxu0  ;;  %v1071_v29 = vpop.f32.mrf.mxu1 }
 0x147   : > { %v1460_v32 = vmax.f32 %v1396_v26, 0.0  ;;  %v1492_v33 = vmax.f32 %v1428_v27, 0.0 }
 0x148   : > { %v946_v34 = vpop.f32.mrf.mxu0  ;;  %v1074_v35 = vpop.f32.mrf.mxu1 }
 0x149   : > { %v2207_v36 = vpack.c.bf16 %v1460_v32, %v1459_v30  ;;  %v2287_v37 = vpack.c.bf16 %v1492_v33, %v1491_v31  ;;  %v1397_v40 = vadd.f32 %v3016_v18, %v946_v34  ;;  %v1429_v41 = vadd.f32 %v3016_v18, %v1074_v35 }
 0x14a   : > { %v948_v38 = vpop.f32.mrf.mxu0  ;;  %v1076_v39 = vpop.f32.mrf.mxu1 }
 0x14b   : > { %2208 = vst [vmem:[%s3023_s29] sm:$0xff] %v2207_v36   ;;  %2379 = vst [vmem:[%s3023_s29 + $0x80] sm:$0xff] %v2287_v37   ;;  %v1461_v48 = vmax.f32 %v1397_v40, 0.0  ;;  %v1493_v49 = vmax.f32 %v1429_v41, 0.0 }
 0x14c   : > { %v949_v42 = vpop.f32.mrf.mxu0  ;;  %v1077_v43 = vpop.f32.mrf.mxu1 }
 0x14d   : > { %v1398_v44 = vadd.f32 %v3016_v18, %v949_v42  ;;  %v1430_v45 = vadd.f32 %v3016_v18, %v1077_v43 }
 0x14e   : > { %v951_v46 = vpop.f32.mrf.mxu0  ;;  %v1079_v47 = vpop.f32.mrf.mxu1 }
 0x14f   : > { %v1462_v50 = vmax.f32 %v1398_v44, 0.0  ;;  %v1494_v51 = vmax.f32 %v1430_v45, 0.0 }
 0x150   : > { %v954_v52 = vpop.f32.mrf.mxu0  ;;  %v1082_v53 = vpop.f32.mrf.mxu1 }
 0x151   : > { %v2212_v54 = vpack.c.bf16 %v1462_v50, %v1461_v48  ;;  %v2292_v55 = vpack.c.bf16 %v1494_v51, %v1493_v49  ;;  %v1399_v58 = vadd.f32 %v3016_v18, %v954_v52  ;;  %v1431_v59 = vadd.f32 %v3016_v18, %v1082_v53 }
 0x152   : > { %v956_v56 = vpop.f32.mrf.mxu0  ;;  %v1084_v57 = vpop.f32.mrf.mxu1 }
 0x153   : > { %2364 = vst [vmem:[%s3023_s29 + $0x8] sm:$0xff] %v2212_v54   ;;  %2380 = vst [vmem:[%s3023_s29 + $0x88] sm:$0xff] %v2292_v55   ;;  %v1463_v2 = vmax.f32 %v1399_v58, 0.0  ;;  %v1495_v3 = vmax.f32 %v1431_v59, 0.0 }
 0x154   : > { %v957_v60 = vpop.f32.mrf.mxu0  ;;  %v1085_v61 = vpop.f32.mrf.mxu1 }
 0x155   : > { %v1400_v62 = vadd.f32 %v3016_v18, %v957_v60  ;;  %v1432_v63 = vadd.f32 %v3016_v18, %v1085_v61 }
 0x156   : > { %v959_v0 = vpop.f32.mrf.mxu0  ;;  %v1087_v1 = vpop.f32.mrf.mxu1 }
 0x157   : > { %v1464_v4 = vmax.f32 %v1400_v62, 0.0  ;;  %v1496_v5 = vmax.f32 %v1432_v63, 0.0 }
 0x158   : > { %v962_v6 = vpop.f32.mrf.mxu0  ;;  %v1090_v7 = vpop.f32.mrf.mxu1 }
 0x159   : > { %v2217_v8 = vpack.c.bf16 %v1464_v4, %v1463_v2  ;;  %v2297_v9 = vpack.c.bf16 %v1496_v5, %v1495_v3  ;;  %v1401_v12 = vadd.f32 %v3016_v18, %v962_v6  ;;  %v1433_v13 = vadd.f32 %v3016_v18, %v1090_v7 }
 0x15a   : > { %v964_v10 = vpop.f32.mrf.mxu0  ;;  %v1092_v11 = vpop.f32.mrf.mxu1 }
 0x15b   : > { %2365 = vst [vmem:[%s3023_s29 + $0x10] sm:$0xff] %v2217_v8   ;;  %2381 = vst [vmem:[%s3023_s29 + $0x90] sm:$0xff] %v2297_v9   ;;  %v1465_v21 = vmax.f32 %v1401_v12, 0.0  ;;  %v1497_v22 = vmax.f32 %v1433_v13, 0.0 }
 0x15c   : > { %v965_v14 = vpop.f32.mrf.mxu0  ;;  %v1093_v15 = vpop.f32.mrf.mxu1 }
 0x15d   : > { %v1402_v16 = vadd.f32 %v3016_v18, %v965_v14  ;;  %v1434_v17 = vadd.f32 %v3016_v18, %v1093_v15 }
 0x15e   : > { %v967_v19 = vpop.f32.mrf.mxu0  ;;  %v1095_v20 = vpop.f32.mrf.mxu1 }
 0x15f   : > { %v1466_v23 = vmax.f32 %v1402_v16, 0.0  ;;  %v1498_v24 = vmax.f32 %v1434_v17, 0.0 }
 0x160   : > { %v970_v25 = vpop.f32.mrf.mxu0  ;;  %v1098_v26 = vpop.f32.mrf.mxu1 }
 0x161   : > { %v2222_v27 = vpack.c.bf16 %v1466_v23, %v1465_v21  ;;  %v2302_v28 = vpack.c.bf16 %v1498_v24, %v1497_v22  ;;  %v1403_v31 = vadd.f32 %v3016_v18, %v970_v25  ;;  %v1435_v32 = vadd.f32 %v3016_v18, %v1098_v26 }
 0x162   : > { %v972_v29 = vpop.f32.mrf.mxu0  ;;  %v1100_v30 = vpop.f32.mrf.mxu1 }
 0x163   : > { %2366 = vst [vmem:[%s3023_s29 + $0x18] sm:$0xff] %v2222_v27   ;;  %2382 = vst [vmem:[%s3023_s29 + $0x98] sm:$0xff] %v2302_v28   ;;  %v1467_v39 = vmax.f32 %v1403_v31, 0.0  ;;  %v1499_v40 = vmax.f32 %v1435_v32, 0.0 }
 0x164   : > { %v973_v33 = vpop.f32.mrf.mxu0  ;;  %v1101_v34 = vpop.f32.mrf.mxu1 }
 0x165   : > { %v1404_v35 = vadd.f32 %v3016_v18, %v973_v33  ;;  %v1436_v36 = vadd.f32 %v3016_v18, %v1101_v34 }
 0x166   : > { %v975_v37 = vpop.f32.mrf.mxu0  ;;  %v1103_v38 = vpop.f32.mrf.mxu1 }
 0x167   : > { %v1468_v41 = vmax.f32 %v1404_v35, 0.0  ;;  %v1500_v42 = vmax.f32 %v1436_v36, 0.0 }
 0x168   : > { %v978_v43 = vpop.f32.mrf.mxu0  ;;  %v1106_v44 = vpop.f32.mrf.mxu1 }
 0x169   : > { %v2227_v45 = vpack.c.bf16 %v1468_v41, %v1467_v39  ;;  %v2307_v46 = vpack.c.bf16 %v1500_v42, %v1499_v40  ;;  %v1405_v49 = vadd.f32 %v3016_v18, %v978_v43  ;;  %v1437_v50 = vadd.f32 %v3016_v18, %v1106_v44 }
 0x16a   : > { %v980_v47 = vpop.f32.mrf.mxu0  ;;  %v1108_v48 = vpop.f32.mrf.mxu1 }
 0x16b   : > { %2367 = vst [vmem:[%s3023_s29 + $0x20] sm:$0xff] %v2227_v45   ;;  %2383 = vst [vmem:[%s3023_s29 + $0xa0] sm:$0xff] %v2307_v46   ;;  %v1469_v57 = vmax.f32 %v1405_v49, 0.0  ;;  %v1501_v58 = vmax.f32 %v1437_v50, 0.0 }
 0x16c   : > { %v981_v51 = vpop.f32.mrf.mxu0  ;;  %v1109_v52 = vpop.f32.mrf.mxu1 }
 0x16d   : > { %v1406_v53 = vadd.f32 %v3016_v18, %v981_v51  ;;  %v1438_v54 = vadd.f32 %v3016_v18, %v1109_v52 }
 0x16e   : > { %v983_v55 = vpop.f32.mrf.mxu0  ;;  %v1111_v56 = vpop.f32.mrf.mxu1 }
 0x16f   : > { %v1470_v59 = vmax.f32 %v1406_v53, 0.0  ;;  %v1502_v60 = vmax.f32 %v1438_v54, 0.0 }
 0x170   : > { %v986_v61 = vpop.f32.mrf.mxu0  ;;  %v1114_v62 = vpop.f32.mrf.mxu1 }
 0x171   : > { %v2232_v63 = vpack.c.bf16 %v1470_v59, %v1469_v57  ;;  %v2312_v0 = vpack.c.bf16 %v1502_v60, %v1501_v58  ;;  %v1407_v3 = vadd.f32 %v3016_v18, %v986_v61  ;;  %v1439_v4 = vadd.f32 %v3016_v18, %v1114_v62 }
 0x172   : > { %v988_v1 = vpop.f32.mrf.mxu0  ;;  %v1116_v2 = vpop.f32.mrf.mxu1 }
 0x173   : > { %2368 = vst [vmem:[%s3023_s29 + $0x28] sm:$0xff] %v2232_v63   ;;  %2384 = vst [vmem:[%s3023_s29 + $0xa8] sm:$0xff] %v2312_v0   ;;  %v1471_v11 = vmax.f32 %v1407_v3, 0.0  ;;  %v1503_v12 = vmax.f32 %v1439_v4, 0.0 }
 0x174   : > { %v989_v5 = vpop.f32.mrf.mxu0  ;;  %v1117_v6 = vpop.f32.mrf.mxu1 }
 0x175   : > { %v1408_v7 = vadd.f32 %v3016_v18, %v989_v5  ;;  %v1440_v8 = vadd.f32 %v3016_v18, %v1117_v6 }
 0x176   : > { %v991_v9 = vpop.f32.mrf.mxu0  ;;  %v1119_v10 = vpop.f32.mrf.mxu1 }
 0x177   : > { %v1472_v13 = vmax.f32 %v1408_v7, 0.0  ;;  %v1504_v14 = vmax.f32 %v1440_v8, 0.0 }
 0x178   : > { %v994_v15 = vpop.f32.mrf.mxu0  ;;  %v1122_v16 = vpop.f32.mrf.mxu1 }
 0x179   : > { %v2237_v17 = vpack.c.bf16 %v1472_v13, %v1471_v11  ;;  %v2317_v19 = vpack.c.bf16 %v1504_v14, %v1503_v12  ;;  %v1409_v22 = vadd.f32 %v3016_v18, %v994_v15  ;;  %v1441_v23 = vadd.f32 %v3016_v18, %v1122_v16 }
 0x17a   : > { %v996_v20 = vpop.f32.mrf.mxu0  ;;  %v1124_v21 = vpop.f32.mrf.mxu1 }
 0x17b   : > { %2369 = vst [vmem:[%s3023_s29 + $0x30] sm:$0xff] %v2237_v17   ;;  %2385 = vst [vmem:[%s3023_s29 + $0xb0] sm:$0xff] %v2317_v19   ;;  %v1473_v30 = vmax.f32 %v1409_v22, 0.0  ;;  %v1505_v31 = vmax.f32 %v1441_v23, 0.0 }
 0x17c   : > { %v997_v24 = vpop.f32.mrf.mxu0  ;;  %v1125_v25 = vpop.f32.mrf.mxu1 }
 0x17d   : > { %v1410_v26 = vadd.f32 %v3016_v18, %v997_v24  ;;  %v1442_v27 = vadd.f32 %v3016_v18, %v1125_v25 }
 0x17e   : > { %v999_v28 = vpop.f32.mrf.mxu0  ;;  %v1127_v29 = vpop.f32.mrf.mxu1 }
 0x17f   : > { %v1474_v32 = vmax.f32 %v1410_v26, 0.0  ;;  %v1506_v33 = vmax.f32 %v1442_v27, 0.0 }
 0x180   : > { %v1002_v34 = vpop.f32.mrf.mxu0  ;;  %v1130_v35 = vpop.f32.mrf.mxu1 }
 0x181   : > { %v2242_v36 = vpack.c.bf16 %v1474_v32, %v1473_v30  ;;  %v2322_v37 = vpack.c.bf16 %v1506_v33, %v1505_v31  ;;  %v1411_v40 = vadd.f32 %v3016_v18, %v1002_v34  ;;  %v1443_v41 = vadd.f32 %v3016_v18, %v1130_v35 }
 0x182   : > { %v1004_v38 = vpop.f32.mrf.mxu0  ;;  %v1132_v39 = vpop.f32.mrf.mxu1 }
 0x183   : > { %2370 = vst [vmem:[%s3023_s29 + $0x38] sm:$0xff] %v2242_v36   ;;  %2386 = vst [vmem:[%s3023_s29 + $0xb8] sm:$0xff] %v2322_v37   ;;  %v1475_v48 = vmax.f32 %v1411_v40, 0.0  ;;  %v1507_v49 = vmax.f32 %v1443_v41, 0.0 }
 0x184   : > { %v1005_v42 = vpop.f32.mrf.mxu0  ;;  %v1133_v43 = vpop.f32.mrf.mxu1 }
 0x185   : > { %v1412_v44 = vadd.f32 %v3016_v18, %v1005_v42  ;;  %v1444_v45 = vadd.f32 %v3016_v18, %v1133_v43 }
 0x186   : > { %v1007_v46 = vpop.f32.mrf.mxu0  ;;  %v1135_v47 = vpop.f32.mrf.mxu1 }
 0x187   : > { %v1476_v50 = vmax.f32 %v1412_v44, 0.0  ;;  %v1508_v51 = vmax.f32 %v1444_v45, 0.0 }
 0x188   : > { %v1010_v52 = vpop.f32.mrf.mxu0  ;;  %v1138_v53 = vpop.f32.mrf.mxu1 }
 0x189   : > { %v2247_v54 = vpack.c.bf16 %v1476_v50, %v1475_v48  ;;  %v2327_v55 = vpack.c.bf16 %v1508_v51, %v1507_v49  ;;  %v1413_v58 = vadd.f32 %v3016_v18, %v1010_v52  ;;  %v1445_v59 = vadd.f32 %v3016_v18, %v1138_v53 }
 0x18a   : > { %v1012_v56 = vpop.f32.mrf.mxu0  ;;  %v1140_v57 = vpop.f32.mrf.mxu1 }
 0x18b   : > { %2371 = vst [vmem:[%s3023_s29 + $0x40] sm:$0xff] %v2247_v54   ;;  %2387 = vst [vmem:[%s3023_s29 + $0xc0] sm:$0xff] %v2327_v55   ;;  %v1477_v2 = vmax.f32 %v1413_v58, 0.0  ;;  %v1509_v3 = vmax.f32 %v1445_v59, 0.0 }
 0x18c   : > { %v1013_v60 = vpop.f32.mrf.mxu0  ;;  %v1141_v61 = vpop.f32.mrf.mxu1 }
 0x18d   : > { %v1414_v62 = vadd.f32 %v3016_v18, %v1013_v60  ;;  %v1446_v63 = vadd.f32 %v3016_v18, %v1141_v61 }
 0x18e   : > { %v1015_v0 = vpop.f32.mrf.mxu0  ;;  %v1143_v1 = vpop.f32.mrf.mxu1 }
 0x18f   : > { %v1478_v4 = vmax.f32 %v1414_v62, 0.0  ;;  %v1510_v5 = vmax.f32 %v1446_v63, 0.0 }
 0x190   : > { %v1018_v6 = vpop.f32.mrf.mxu0  ;;  %v1146_v7 = vpop.f32.mrf.mxu1 }
 0x191   : > { %v2252_v8 = vpack.c.bf16 %v1478_v4, %v1477_v2  ;;  %v2332_v9 = vpack.c.bf16 %v1510_v5, %v1509_v3  ;;  %v1415_v12 = vadd.f32 %v3016_v18, %v1018_v6  ;;  %v1447_v13 = vadd.f32 %v3016_v18, %v1146_v7 }
 0x192   : > { %v1020_v10 = vpop.f32.mrf.mxu0  ;;  %v1148_v11 = vpop.f32.mrf.mxu1 }
 0x193   : > { %2372 = vst [vmem:[%s3023_s29 + $0x48] sm:$0xff] %v2252_v8   ;;  %2388 = vst [vmem:[%s3023_s29 + $0xc8] sm:$0xff] %v2332_v9   ;;  %v1479_v21 = vmax.f32 %v1415_v12, 0.0  ;;  %v1511_v22 = vmax.f32 %v1447_v13, 0.0 }
 0x194   : > { %v1021_v14 = vpop.f32.mrf.mxu0  ;;  %v1149_v15 = vpop.f32.mrf.mxu1 }
 0x195   : > { %v1416_v16 = vadd.f32 %v3016_v18, %v1021_v14  ;;  %v1448_v17 = vadd.f32 %v3016_v18, %v1149_v15 }
 0x196   : > { %v1023_v19 = vpop.f32.mrf.mxu0  ;;  %v1151_v20 = vpop.f32.mrf.mxu1 }
 0x197   : > { %v1480_v23 = vmax.f32 %v1416_v16, 0.0  ;;  %v1512_v24 = vmax.f32 %v1448_v17, 0.0 }
 0x198   : > { %v1026_v25 = vpop.f32.mrf.mxu0  ;;  %v1154_v26 = vpop.f32.mrf.mxu1 }
 0x199   : > { %v2257_v27 = vpack.c.bf16 %v1480_v23, %v1479_v21  ;;  %v2337_v28 = vpack.c.bf16 %v1512_v24, %v1511_v22  ;;  %v1417_v31 = vadd.f32 %v3016_v18, %v1026_v25  ;;  %v1449_v32 = vadd.f32 %v3016_v18, %v1154_v26 }
 0x19a   : > { %v1028_v29 = vpop.f32.mrf.mxu0  ;;  %v1156_v30 = vpop.f32.mrf.mxu1 }
 0x19b   : > { %2373 = vst [vmem:[%s3023_s29 + $0x50] sm:$0xff] %v2257_v27   ;;  %2389 = vst [vmem:[%s3023_s29 + $0xd0] sm:$0xff] %v2337_v28   ;;  %v1481_v39 = vmax.f32 %v1417_v31, 0.0  ;;  %v1513_v40 = vmax.f32 %v1449_v32, 0.0 }
 0x19c   : > { %v1029_v33 = vpop.f32.mrf.mxu0  ;;  %v1157_v34 = vpop.f32.mrf.mxu1 }
 0x19d   : > { %v1418_v35 = vadd.f32 %v3016_v18, %v1029_v33  ;;  %v1450_v36 = vadd.f32 %v3016_v18, %v1157_v34 }
 0x19e   : > { %v1031_v37 = vpop.f32.mrf.mxu0  ;;  %v1159_v38 = vpop.f32.mrf.mxu1 }
 0x19f   : > { %v1482_v41 = vmax.f32 %v1418_v35, 0.0  ;;  %v1514_v42 = vmax.f32 %v1450_v36, 0.0 }
 0x1a0   : > { %v1034_v43 = vpop.f32.mrf.mxu0  ;;  %v1162_v44 = vpop.f32.mrf.mxu1 }
 0x1a1   : > { %v2262_v45 = vpack.c.bf16 %v1482_v41, %v1481_v39  ;;  %v2342_v46 = vpack.c.bf16 %v1514_v42, %v1513_v40  ;;  %v1419_v49 = vadd.f32 %v3016_v18, %v1034_v43  ;;  %v1451_v50 = vadd.f32 %v3016_v18, %v1162_v44 }
 0x1a2   : > { %v1036_v47 = vpop.f32.mrf.mxu0  ;;  %v1164_v48 = vpop.f32.mrf.mxu1 }
 0x1a3   : > { %2374 = vst [vmem:[%s3023_s29 + $0x58] sm:$0xff] %v2262_v45   ;;  %2390 = vst [vmem:[%s3023_s29 + $0xd8] sm:$0xff] %v2342_v46   ;;  %v1483_v57 = vmax.f32 %v1419_v49, 0.0  ;;  %v1515_v58 = vmax.f32 %v1451_v50, 0.0 }
 0x1a4   : > { %v1037_v51 = vpop.f32.mrf.mxu0  ;;  %v1165_v52 = vpop.f32.mrf.mxu1 }
 0x1a5   : > { %v1420_v53 = vadd.f32 %v3016_v18, %v1037_v51  ;;  %v1452_v54 = vadd.f32 %v3016_v18, %v1165_v52 }
 0x1a6   : > { %v1039_v55 = vpop.f32.mrf.mxu0  ;;  %v1167_v56 = vpop.f32.mrf.mxu1 }
 0x1a7   : > { %v1484_v59 = vmax.f32 %v1420_v53, 0.0  ;;  %v1516_v60 = vmax.f32 %v1452_v54, 0.0 }
 0x1a8   : > { %v1042_v61 = vpop.f32.mrf.mxu0  ;;  %v1170_v62 = vpop.f32.mrf.mxu1 }
 0x1a9   : > { %v2267_v63 = vpack.c.bf16 %v1484_v59, %v1483_v57  ;;  %v2347_v0 = vpack.c.bf16 %v1516_v60, %v1515_v58  ;;  %v1421_v3 = vadd.f32 %v3016_v18, %v1042_v61  ;;  %v1453_v4 = vadd.f32 %v3016_v18, %v1170_v62 }
 0x1aa   : > { %v1044_v1 = vpop.f32.mrf.mxu0  ;;  %v1172_v2 = vpop.f32.mrf.mxu1 }
 0x1ab   : > { %2375 = vst [vmem:[%s3023_s29 + $0x60] sm:$0xff] %v2267_v63   ;;  %2391 = vst [vmem:[%s3023_s29 + $0xe0] sm:$0xff] %v2347_v0   ;;  %v1485_v11 = vmax.f32 %v1421_v3, 0.0  ;;  %v1517_v12 = vmax.f32 %v1453_v4, 0.0 }
 0x1ac   : > { %v1045_v5 = vpop.f32.mrf.mxu0  ;;  %v1173_v6 = vpop.f32.mrf.mxu1 }
 0x1ad   : > { %v1422_v7 = vadd.f32 %v3016_v18, %v1045_v5  ;;  %v1454_v8 = vadd.f32 %v3016_v18, %v1173_v6 }
 0x1ae   : > { %v1047_v9 = vpop.f32.mrf.mxu0  ;;  %v1175_v10 = vpop.f32.mrf.mxu1 }
 0x1af   : > { %v1486_v13 = vmax.f32 %v1422_v7, 0.0  ;;  %v1518_v14 = vmax.f32 %v1454_v8, 0.0 }
 0x1b0   : > { %v1050_v15 = vpop.f32.mrf.mxu0  ;;  %v1178_v16 = vpop.f32.mrf.mxu1 }
 0x1b1   : > { %v2272_v17 = vpack.c.bf16 %v1486_v13, %v1485_v11  ;;  %v2352_v19 = vpack.c.bf16 %v1518_v14, %v1517_v12  ;;  %v1423_v22 = vadd.f32 %v3016_v18, %v1050_v15  ;;  %v1455_v23 = vadd.f32 %v3016_v18, %v1178_v16 }
 0x1b2   : > { %v1052_v20 = vpop.f32.mrf.mxu0  ;;  %v1180_v21 = vpop.f32.mrf.mxu1 }
 0x1b3   : > { %2376 = vst [vmem:[%s3023_s29 + $0x68] sm:$0xff] %v2272_v17   ;;  %2392 = vst [vmem:[%s3023_s29 + $0xe8] sm:$0xff] %v2352_v19   ;;  %v1487_v30 = vmax.f32 %v1423_v22, 0.0  ;;  %v1519_v31 = vmax.f32 %v1455_v23, 0.0 }
 0x1b4   : > { %v1053_v24 = vpop.f32.mrf.mxu0  ;;  %v1181_v25 = vpop.f32.mrf.mxu1 }
 0x1b5   : > { %v1424_v26 = vadd.f32 %v3016_v18, %v1053_v24  ;;  %v1456_v27 = vadd.f32 %v3016_v18, %v1181_v25 }
 0x1b6   : > { %v1055_v28 = vpop.f32.mrf.mxu0  ;;  %v1183_v29 = vpop.f32.mrf.mxu1 }
 0x1b7   : > { %v1488_v32 = vmax.f32 %v1424_v26, 0.0  ;;  %v1520_v33 = vmax.f32 %v1456_v27, 0.0 }
 0x1b8   : > { %v1058_v34 = vpop.f32.mrf.mxu0  ;;  %v1186_v35 = vpop.f32.mrf.mxu1 }
 0x1b9   : > { %v2277_v36 = vpack.c.bf16 %v1488_v32, %v1487_v30  ;;  %v2357_v37 = vpack.c.bf16 %v1520_v33, %v1519_v31  ;;  %v1425_v40 = vadd.f32 %v3016_v18, %v1058_v34  ;;  %v1457_v41 = vadd.f32 %v3016_v18, %v1186_v35 }
 0x1ba   : > { %v1060_v38 = vpop.f32.mrf.mxu0  ;;  %v1188_v39 = vpop.f32.mrf.mxu1 }
 0x1bb   : > { %2377 = vst [vmem:[%s3023_s29 + $0x70] sm:$0xff] %v2277_v36   ;;  %2393 = vst [vmem:[%s3023_s29 + $0xf0] sm:$0xff] %v2357_v37   ;;  %v1489_v48 = vmax.f32 %v1425_v40, 0.0  ;;  %v1521_v49 = vmax.f32 %v1457_v41, 0.0 }
 0x1bc   : > { %v1061_v42 = vpop.f32.mrf.mxu0  ;;  %v1189_v43 = vpop.f32.mrf.mxu1 }
 0x1bd   : > { %v1426_v44 = vadd.f32 %v3016_v18, %v1061_v42  ;;  %v1458_v45 = vadd.f32 %v3016_v18, %v1189_v43 }
 0x1be   : > { %v1063_v46 = vpop.f32.mrf.mxu0  ;;  %v1191_v47 = vpop.f32.mrf.mxu1 }
 0x1bf   : > { %v1490_v50 = vmax.f32 %v1426_v44, 0.0  ;;  %v1522_v51 = vmax.f32 %v1458_v45, 0.0 }
 0x1c1   : > { %v2282_v18 = vpack.c.bf16 %v1490_v50, %v1489_v48  ;;  %v2362_v52 = vpack.c.bf16 %v1522_v51, %v1521_v49 }
 0x1c3   : > { %2378 = vst [vmem:[%s3023_s29 + $0x78] sm:$0xff] %v2282_v18   ;;  %2394 = vst [vmem:[%s3023_s29 + $0xf8] sm:$0xff] %v2362_v52  }
 0x1c4   : > { %2686 = shalt.err (!%p2683_p3)
}
 0x1c5   : > { %s2687_s26 = scalar_lea.hbm %s3120_s7, 4096  ;;  %s2691_s20 = scalar_lea.hbm %s3174_s3, 16384 }
 0x1c6   : > { %p2688_p5 = scmp.ne.s32.totalorder %s3120_s7, %s2687_s26  ;;  %p2692_p6 = scmp.lt.s32.totalorder %s3120_s7, %s3174_s3 }
 0x1c7   : > { %p2693_p11 = scmp.lt.s32.totalorder %s2691_s20, %s2687_s26 }
 0x1c8   : > { %p2689_p7 = pnand %p2688_p5, %p3185_p4 }
 0x1c9   : > { %p2694_p10 = por %p2693_p11, %p2692_p6 }
 0x1ca   : > { %p2690_p9 = pneg %p2689_p7 }
 0x1cc   : > { %p2695_p1 = pnand %p2694_p10, %p2690_p9 }
 0x1ce   : > { %2698 = shalt.err (!%p2695_p1)
}
 0x1cf   : > { %s2767_s29 = smov 64   ;;  %s2768_s4 = smov 4  }
 0x1d0   : > { %2433 = dma.vmem_to_hbm [thread:$0]  (%p3185_p4), %s3122_s21, 4096, %s3120_s7, %s1844_s15, %s2767_s29, %s2767_s29, %s2768_s4  }
 0x1d1 PF: > { %p2450_p8 = scmp.ge.s32.totalorder %s2757_s17, 2  ;;  %s1873_s5 = sand.u32 1, %s2737_s12  }
 0x1d2   : > { %p3186_p12 = scmp.ne.s32.totalorder %s3179_s23, 0  ;;  %s1874_s6 = scalar_lea.sflag [#allocation5], %s1873_s5 }
 0x1d4   : > { %p2444_p13 = pnand %p2450_p8, %p3186_p12 }
 0x1d6   : > { %p2445_p0 = pneg %p2444_p13 }
 0x1d8   : > { %2732 = dma.done.wait (%p2445_p0), %s1874_s6, 4096  }
 0x1d9   : > { %2734 = vsyncadd (%p2445_p0), %s1874_s6, 4294963200  ;;  %s20_s17 = sadd.s32 1, %s2757_s17   ;;  %s3187_s12 = smov %s2741_s13 }
 0x1da   : > { %p17_p2 = scmp.ge.s32.totalorder %s20_s17, 6   ;;  %s3188_s13 = smov %s2745_s14 }
 0x1db   : > { %s3189_s14 = smov %s2884_s19  ;;  %s3190_s15 = smov %s2753_s16 }
 0x1dc   : > { %s3191_s16 = smov %s3193_s28  ;;  %19 = sbr.rel (!%p17_p2) target bundleno = 7 (0x7), region = 93 }
 0x1e1   :  { %1879 = vsyncpa [#allocation4], 1 }
 0x1e2   :  { %1881 = vsyncpa [#allocation4 + $0x1], 1 }
 0x1e3   :  { %1882 = vsyncpa [#allocation7], 1 }
 0x1e4   :  { %1883 = vsyncpa [#allocation5], 1 }
 0x1e5   :  { %1885 = vsyncpa [#allocation5 + $0x1], 1 }

</bundles_post_ra>
